<compile_context>
chip_gen: v7x
topology: tpu7x:2x2x1
jax: 0.10.0
libtpu: 0.0.40
codegen_flags: <defaults>
</compile_context>

<pallas_src>
import jax
import jax.numpy as jnp
from jax import lax
from jax.experimental import pallas as pl
from jax.experimental.pallas import tpu as pltpu

LANE = 128
SUBLANE = 8


def _round_up(n, m):
    return ((n + m - 1) // m) * m


def _tpu_config():
    """Generation-conditional (vmem_limit_bytes, fused-MLP row tile)."""
    try:
        vmem_bytes = pltpu.get_tpu_info().vmem_capacity_bytes
    except Exception:
        vmem_bytes = 64 * 1024 * 1024          # assume smallest (v7x) if unknown
    if vmem_bytes >= 100 * 1024 * 1024:        # v5e / v6e: 128 MiB physical VMEM
        return 100 * 1024 * 1024, 512
    return 48 * 1024 * 1024, 256               # v7x: 64 MiB physical VMEM


VMEM_LIMIT_BYTES, DEFAULT_TM = _tpu_config()


def _with_single_buffer_fallback(fn, *args, **kwargs):
    """Try pipeline_mode=pl.Buffered(1) on resident weight blocks; fall back to
    default double-buffering if this Pallas build rejects buffer_count=1."""
    try:
        return jax.block_until_ready(
            fn(*args, single_buffer_weights=True, **kwargs))
    except Exception:
        return fn(*args, single_buffer_weights=False, **kwargs)


# ----------------------------------------------------------------------------
# Fused multi-layer FC kernel: chained Linear -> optional Hardtanh(0, clip).
# Row-tiled; weights stay VMEM-resident (constant index, single-buffered).
# Matmul operands bf16, accumulation + clip in f32.
# ----------------------------------------------------------------------------
def _make_mlp_kernel(clips):
    n_layers = len(clips)

    def kernel(x_ref, *refs):
        o_ref = refs[-1]
        h = x_ref[...]                                   # bf16 row tile
        for li in range(n_layers):
            w_ref = refs[2 * li]
            b_ref = refs[2 * li + 1]
            acc = jnp.dot(h, w_ref[...], preferred_element_type=jnp.float32)
            acc = acc + b_ref[...]
            if clips[li] is not None:
                acc = jnp.clip(acc, 0.0, clips[li])      # Hardtanh(0, relu_clip)
            # Re-narrow to bf16 only where it feeds the next MXU matmul.
            h = acc.astype(jnp.bfloat16) if li + 1 < n_layers else acc
        o_ref[...] = h.astype(o_ref.dtype)

    return kernel


def fused_mlp(x, layers, out_dtype, *, tm=None, single_buffer_weights=True):
    """x: [M, In] bf16 (In a multiple of 128).
    layers: list of (w[In,Out] bf16, b[Out] f32, clip-or-None).
    Returns [M, Out_last] with dtype out_dtype."""
    if tm is None:
        tm = DEFAULT_TM
    M, In = x.shape
    tm_eff = max(SUBLANE, (min(tm, M) // SUBLANE) * SUBLANE)
    Mp = _round_up(M, tm_eff)
    if Mp != M:
        x = jnp.zeros((Mp, In), x.dtype).at[:M].set(x)

    def wspec(shape):
        if single_buffer_weights:
            return pl.BlockSpec(shape, lambda i: (0, 0),
                                pipeline_mode=pl.Buffered(1))
        return pl.BlockSpec(shape, lambda i: (0, 0))

    out_dim = layers[-1][0].shape[1]
    in_specs = [pl.BlockSpec((tm_eff, In), lambda i: (i, 0))]
    args = [x]
    for (w, b, _clip) in layers:
        fin, fout = w.shape
        in_specs.append(wspec((fin, fout)))
        in_specs.append(wspec((1, fout)))
        args.append(w)
        args.append(b.reshape(1, fout))
    clips = tuple(c for (_, _, c) in layers)

    out = pl.pallas_call(
        _make_mlp_kernel(clips),
        out_shape=jax.ShapeDtypeStruct((Mp, out_dim), out_dtype),
        grid=(Mp // tm_eff,),
        in_specs=in_specs,
        out_specs=pl.BlockSpec((tm_eff, out_dim), lambda i: (i, 0)),
        compiler_params=pltpu.CompilerParams(
            dimension_semantics=("parallel",),
            vmem_limit_bytes=VMEM_LIMIT_BYTES,
        ),
    )(*args)
    return out[:M] if Mp != M else out


# ----------------------------------------------------------------------------
# Time-chunked bidirectional LSTM with the x @ W_ih input projection fused in.
# Grid = (direction=2 ["parallel"], chunk=T//TC ["arbitrary"]).
# Per chunk: one big [TC*Bp, Gp] @ [Gp, 4*Hp] MXU matmul into VMEM scratch,
# then an unrolled fori_loop over the TC recurrent steps (h @ W_hh only).
# PyTorch gate order (i, f, g, o), each gate padded to Hp = 128 lanes.
# ----------------------------------------------------------------------------
def _bilstm_kernel(xproj_ref, wih_ref, b_ref, whh_ref, o_ref,
                   gates_sc, h_sc, c_sc):
    d = pl.program_id(0)                 # 0 = forward, 1 = backward

    @pl.when(pl.program_id(1) == 0)
    def _():
        h_sc[...] = jnp.zeros_like(h_sc)
        c_sc[...] = jnp.zeros_like(c_sc)

    TC, Bp, Gp = xproj_ref.shape
    Hp = h_sc.shape[-1]

    # Hoisted input projection for the whole chunk (bf16 operands, f32 acc).
    g = jnp.dot(xproj_ref[...].reshape(TC * Bp, Gp), wih_ref[...],
                preferred_element_type=jnp.float32) + b_ref[...]
    gates_sc[...] = g.reshape(TC, Bp, 4 * Hp)

    def step(i, carry):
        # forward (d==0): chunk-local index i; backward (d==1): TC-1-i.
        j = (1 - d) * i + d * (TC - 1 - i)
        gates = gates_sc[j] + jnp.dot(
            h_sc[...].astype(jnp.bfloat16), whh_ref[...],
            preferred_element_type=jnp.float32)
        i_g = jax.nn.sigmoid(gates[:, 0 * Hp:1 * Hp])
        f_g = jax.nn.sigmoid(gates[:, 1 * Hp:2 * Hp])
        g_g = jnp.tanh(gates[:, 2 * Hp:3 * Hp])
        o_g = jax.nn.sigmoid(gates[:, 3 * Hp:4 * Hp])
        c_new = f_g * c_sc[...] + i_g * g_g
        h_new = o_g * jnp.tanh(c_new)
        c_sc[...] = c_new
        h_sc[...] = h_new
        o_ref[j] = h_new.astype(o_ref.dtype)
        return carry

    lax.fori_loop(0, TC, step, 0, unroll=True)


def bilstm_recurrence(xproj, w_ih_both, b_both, w_hh_both, Hp, *,
                      time_chunk=16, single_buffer_weights=True):
    """xproj: [T, Bp, Gp] bf16 (fc3 activation).
    w_ih_both: [2, Gp, 4*Hp] bf16; b_both: [2, 1, 4*Hp] f32;
    w_hh_both: [2, Hp, 4*Hp] bf16.
    Returns [T, Bp, 2*Hp] bf16: columns [0:Hp] forward hidden, [Hp:2*Hp]
    backward hidden at each original time index (lane-dense, no wrapper concat).
    NOTE: at small batch (Bp=8) the recurrent matmul uses few MXU rows; pack
    multiple utterances before this stage to recover MXU throughput."""
    T, Bp, Gp = xproj.shape
    # Largest chunk <= time_chunk that divides T: keeps the reversed backward
    # block mapping exact without padding the time axis.
    TC = 1
    for cand in range(1, min(T, time_chunk) + 1):
        if T % cand == 0:
            TC = cand
    NC = T // TC

    def x_map(d, c):
        return ((1 - d) * c + d * (NC - 1 - c), 0, 0)

    def out_map(d, c):
        return ((1 - d) * c + d * (NC - 1 - c), 0, d)

    def wspec(shape):
        if single_buffer_weights:
            return pl.BlockSpec(shape, lambda d, c: (d, 0, 0),
                                pipeline_mode=pl.Buffered(1))
        return pl.BlockSpec(shape, lambda d, c: (d, 0, 0))

    return pl.pallas_call(
        _bilstm_kernel,
        out_shape=jax.ShapeDtypeStruct((T, Bp, 2 * Hp), jnp.bfloat16),
        grid=(2, NC),
        in_specs=[
            pl.BlockSpec((TC, Bp, Gp), x_map),
            wspec((pl.Squeezed(), Gp, 4 * Hp)),
            wspec((pl.Squeezed(), 1, 4 * Hp)),
            wspec((pl.Squeezed(), Hp, 4 * Hp)),
        ],
        out_specs=pl.BlockSpec((TC, Bp, Hp), out_map),
        scratch_shapes=[
            pltpu.VMEM((TC, Bp, 4 * Hp), jnp.float32),   # chunk input gates
            pltpu.VMEM((Bp, Hp), jnp.float32),           # h state
            pltpu.VMEM((Bp, Hp), jnp.float32),           # c state
        ],
        compiler_params=pltpu.CompilerParams(
            dimension_semantics=("parallel", "arbitrary"),
            vmem_limit_bytes=VMEM_LIMIT_BYTES,
        ),
    )(xproj, w_ih_both, b_both, w_hh_both)


# ----------------------------------------------------------------------------
# Parameter construction (deterministic, synthetic), pre-padded to TPU layout.
# Weights bf16 (MXU operands), biases f32.
# ----------------------------------------------------------------------------
def init_params(key, in_features, n_hidden, out_features, forget_gate_bias=1.0):
    H = n_hidden
    In_p = _round_up(in_features, LANE)
    Hp = _round_up(H, LANE)
    Gp = _round_up(2 * H, LANE)          # LSTM input size (= fc3 out), padded
    Op = _round_up(out_features, LANE)
    bf16 = jnp.bfloat16

    def lin(k, fin, fout):
        kw, kb = jax.random.split(k)
        bound = 1.0 / jnp.sqrt(fin)
        w = jax.random.uniform(kw, (fin, fout), jnp.float32, -bound, bound)
        b = jax.random.uniform(kb, (fout,), jnp.float32, -bound, bound)
        return w, b

    def pad2(a, r, c):
        return jnp.zeros((r, c), jnp.float32).at[:a.shape[0], :a.shape[1]].set(a)

    def pad1(a, n):
        return jnp.zeros((n,), jnp.float32).at[:a.shape[0]].set(a)

    def pad_gates2(w, rows_p):  # [fin, 4H] -> [rows_p, 4*Hp], per-gate padded
        return jnp.concatenate(
            [pad2(w[:, g * H:(g + 1) * H], rows_p, Hp) for g in range(4)], axis=1)

    def pad_gates1(b):          # [4H] -> [4*Hp]
        return jnp.concatenate(
            [pad1(b[g * H:(g + 1) * H], Hp) for g in range(4)])

    def lstm_dir(k, fin, hid):
        k1, k2, k3 = jax.random.split(k, 3)
        bound = 1.0 / jnp.sqrt(hid)
        w_ih = jax.random.uniform(k1, (fin, 4 * hid), jnp.float32, -bound, bound)
        w_hh = jax.random.uniform(k2, (hid, 4 * hid), jnp.float32, -bound, bound)
        b = jax.random.uniform(k3, (4 * hid,), jnp.float32, -bound, bound)
        # Combined (b_ih + b_hh); forget gate total initialised to the target.
        b = b.at[hid:2 * hid].set(forget_gate_bias)
        return w_ih, w_hh, b

    keys = jax.random.split(key, 7)
    p = {}

    w1, b1 = lin(keys[0], in_features, H)
    w2, b2 = lin(keys[1], H, H)
    w3, b3 = lin(keys[2], H, 2 * H)
    p["fc1"] = (pad2(w1, In_p, Hp).astype(bf16), pad1(b1, Hp))
    p["fc2"] = (pad2(w2, Hp, Hp).astype(bf16), pad1(b2, Hp))
    p["fc3"] = (pad2(w3, Hp, Gp).astype(bf16), pad1(b3, Gp))

    wih_f, whh_f, bg_f = lstm_dir(keys[3], 2 * H, H)
    wih_b, whh_b, bg_b = lstm_dir(keys[4], 2 * H, H)
    p["w_ih_both"] = jnp.stack(
        [pad_gates2(wih_f, Gp), pad_gates2(wih_b, Gp)], axis=0).astype(bf16)
    p["b_both"] = jnp.stack(
        [pad_gates1(bg_f), pad_gates1(bg_b)], axis=0).reshape(2, 1, 4 * Hp)
    p["w_hh_both"] = jnp.stack(
        [pad_gates2(whh_f, Hp), pad_gates2(whh_b, Hp)], axis=0).astype(bf16)

    # fc4 consumes [h_fwd | h_bwd] laid out in padded column halves.
    w4, b4 = lin(keys[5], 2 * H, H)
    w4_p = jnp.zeros((2 * Hp, Hp), jnp.float32)
    w4_p = w4_p.at[0:H, 0:H].set(w4[0:H])
    w4_p = w4_p.at[Hp:Hp + H, 0:H].set(w4[H:2 * H])
    p["fc4"] = (w4_p.astype(bf16), pad1(b4, Hp))

    wo, bo = lin(keys[6], H, out_features)
    p["out"] = (pad2(wo, Hp, Op).astype(bf16), pad1(bo, Op))
    return p


# ----------------------------------------------------------------------------
# Forward pass (matches DeepSpeech1.forward semantics, eval mode).
# ----------------------------------------------------------------------------
def deep_speech_1_forward(x, seq_lens, params, out_features, relu_clip=20.0):
    B, C, F, T = x.shape
    In = C * F
    In_p = params["fc1"][0].shape[0]
    Hp = params["fc1"][0].shape[1]
    Gp = params["fc3"][0].shape[1]
    Op = params["out"][0].shape[1]
    Bp = _round_up(max(B, SUBLANE), SUBLANE)

    # [B, C, F, T] -> [T, B, C*F]; pad batch->Bp sublanes / features->In_p
    # lanes once and cast to bf16; downstream stays time-major and lane-dense.
    h = x.reshape(B, In, T).transpose(2, 0, 1).astype(jnp.bfloat16)
    h_p = jnp.zeros((T, Bp, In_p), jnp.bfloat16).at[:, :B, :In].set(h)
    h_p = h_p.reshape(T * Bp, In_p)

    # Stage 1: fused fc1 -> fc2 -> fc3 (each Linear + Hardtanh(0, relu_clip)).
    w1, b1 = params["fc1"]
    w2, b2 = params["fc2"]
    w3, b3 = params["fc3"]
    xproj = _with_single_buffer_fallback(
        fused_mlp, h_p,
        [(w1, b1, relu_clip), (w2, b2, relu_clip), (w3, b3, relu_clip)],
        jnp.bfloat16)                                       # [T*Bp, Gp] bf16
    xproj = xproj.reshape(T, Bp, Gp)

    # Stage 2: time-chunked bidirectional LSTM (x @ W_ih fused inside).
    lstm_out = _with_single_buffer_fallback(
        bilstm_recurrence, xproj, params["w_ih_both"], params["b_both"],
        params["w_hh_both"], Hp)                            # [T, Bp, 2*Hp] bf16

    # Stage 3: fused fc4 -> out.
    h2 = lstm_out.reshape(T * Bp, 2 * Hp)
    w4, b4 = params["fc4"]
    wo, bo = params["out"]
    out_p = _with_single_buffer_fallback(
        fused_mlp, h2, [(w4, b4, relu_clip), (wo, bo, None)], jnp.float32)

    out = out_p.reshape(T, Bp, Op)[:, :B, :out_features]    # [T, B, out_feats]
    return out, seq_lens


if __name__ == "__main__":
    # Small shapes consistent with the module's forward contract.
    batch, channels, features, seq_len = 2, 4, 16, 8
    in_features = channels * features  # 64
    n_hidden = 32
    out_features = 26
    relu_clip = 20.0

    key = jax.random.PRNGKey(0)
    k_x, k_p = jax.random.split(key)
    x = jax.random.normal(
        k_x, (batch, channels, features, seq_len), dtype=jnp.float32)
    seq_lens = jnp.full((batch,), seq_len, dtype=jnp.int32)

    params = init_params(k_p, in_features, n_hidden, out_features,
                         forget_gate_bias=1.0)

    out, out_lens = deep_speech_1_forward(
        x, seq_lens, params, out_features, relu_clip)
    out = jax.block_until_ready(out)
    out_lens = jax.block_until_ready(out_lens)

    assert out.shape == (seq_len, batch, out_features), out.shape
    assert out_lens.shape == (batch,)
    assert bool(jnp.all(jnp.isfinite(out)))
    print("KERNEL_OK")
</pallas_src>

<mosaic_0001>
module attributes {stable_mosaic.version = 11 : i64} {
  func.func @kernel(%arg0: i32, %arg1: memref<64x128xbf16, #tpu.memory_space<vmem>>, %arg2: memref<128x128xbf16, #tpu.memory_space<vmem>>, %arg3: memref<1x128xf32, #tpu.memory_space<vmem>>, %arg4: memref<128x128xbf16, #tpu.memory_space<vmem>>, %arg5: memref<1x128xf32, #tpu.memory_space<vmem>>, %arg6: memref<128x128xbf16, #tpu.memory_space<vmem>>, %arg7: memref<1x128xf32, #tpu.memory_space<vmem>>, %arg8: memref<64x128xbf16, #tpu.memory_space<vmem>>) attributes {dimension_semantics = [#tpu.dimension_semantics<parallel>], iteration_bounds = array<i64: 1>, scalar_prefetch = 0 : i64, scratch_operands = 0 : i64, tpu.core_type = #tpu.core_type<tc>, window_params = [{transform_indices = @transform_0, window_bounds = array<i64: 64, 128>}, {pipeline_mode = #tpu.pipeline_mode<synchronous>, transform_indices = @transform_1, window_bounds = array<i64: 128, 128>}, {pipeline_mode = #tpu.pipeline_mode<synchronous>, transform_indices = @transform_2, window_bounds = array<i64: 1, 128>}, {pipeline_mode = #tpu.pipeline_mode<synchronous>, transform_indices = @transform_3, window_bounds = array<i64: 128, 128>}, {pipeline_mode = #tpu.pipeline_mode<synchronous>, transform_indices = @transform_4, window_bounds = array<i64: 1, 128>}, {pipeline_mode = #tpu.pipeline_mode<synchronous>, transform_indices = @transform_5, window_bounds = array<i64: 128, 128>}, {pipeline_mode = #tpu.pipeline_mode<synchronous>, transform_indices = @transform_6, window_bounds = array<i64: 1, 128>}, {transform_indices = @transform_7, window_bounds = array<i64: 64, 128>}]} {
    %c0 = arith.constant 0 : index
    %c0_0 = arith.constant 0 : index
    %0 = vector.load %arg1[%c0, %c0_0] : memref<64x128xbf16, #tpu.memory_space<vmem>>, vector<64x128xbf16>
    %c0_1 = arith.constant 0 : index
    %c0_2 = arith.constant 0 : index
    %1 = vector.load %arg2[%c0_1, %c0_2] : memref<128x128xbf16, #tpu.memory_space<vmem>>, vector<128x128xbf16>
    %cst = arith.constant dense<0.000000e+00> : vector<64x128xf32>
    %2 = tpu.matmul %0, %1, %cst {dimension_numbers = #tpu.dot_dimension_numbers<[1], [0], [0], [1], [0, 0, 1, 1], [], []>} : vector<64x128xbf16>, vector<128x128xbf16>, vector<64x128xf32> -> vector<64x128xf32>
    %c0_3 = arith.constant 0 : index
    %c0_4 = arith.constant 0 : index
    %3 = vector.load %arg3[%c0_3, %c0_4] : memref<1x128xf32, #tpu.memory_space<vmem>>, vector<1x128xf32>
    %4 = vector.broadcast %3 : vector<1x128xf32> to vector<64x128xf32>
    %5 = arith.addf %2, %4 : vector<64x128xf32>
    %cst_5 = arith.constant 0.000000e+00 : f32
    %cst_6 = arith.constant 2.000000e+01 : f32
    %6 = vector.broadcast %cst_5 : f32 to vector<64x128xf32>
    %7 = arith.maximumf %6, %5 : vector<64x128xf32>
    %8 = vector.broadcast %cst_6 : f32 to vector<64x128xf32>
    %9 = arith.minimumf %8, %7 : vector<64x128xf32>
    %10 = arith.truncf %9 : vector<64x128xf32> to vector<64x128xbf16>
    %c0_7 = arith.constant 0 : index
    %c0_8 = arith.constant 0 : index
    %11 = vector.load %arg4[%c0_7, %c0_8] : memref<128x128xbf16, #tpu.memory_space<vmem>>, vector<128x128xbf16>
    %cst_9 = arith.constant dense<0.000000e+00> : vector<64x128xf32>
    %12 = tpu.matmul %10, %11, %cst_9 {dimension_numbers = #tpu.dot_dimension_numbers<[1], [0], [0], [1], [0, 0, 1, 1], [], []>} : vector<64x128xbf16>, vector<128x128xbf16>, vector<64x128xf32> -> vector<64x128xf32>
    %c0_10 = arith.constant 0 : index
    %c0_11 = arith.constant 0 : index
    %13 = vector.load %arg5[%c0_10, %c0_11] : memref<1x128xf32, #tpu.memory_space<vmem>>, vector<1x128xf32>
    %14 = vector.broadcast %13 : vector<1x128xf32> to vector<64x128xf32>
    %15 = arith.addf %12, %14 : vector<64x128xf32>
    %cst_12 = arith.constant 0.000000e+00 : f32
    %cst_13 = arith.constant 2.000000e+01 : f32
    %16 = vector.broadcast %cst_12 : f32 to vector<64x128xf32>
    %17 = arith.maximumf %16, %15 : vector<64x128xf32>
    %18 = vector.broadcast %cst_13 : f32 to vector<64x128xf32>
    %19 = arith.minimumf %18, %17 : vector<64x128xf32>
    %20 = arith.truncf %19 : vector<64x128xf32> to vector<64x128xbf16>
    %c0_14 = arith.constant 0 : index
    %c0_15 = arith.constant 0 : index
    %21 = vector.load %arg6[%c0_14, %c0_15] : memref<128x128xbf16, #tpu.memory_space<vmem>>, vector<128x128xbf16>
    %cst_16 = arith.constant dense<0.000000e+00> : vector<64x128xf32>
    %22 = tpu.matmul %20, %21, %cst_16 {dimension_numbers = #tpu.dot_dimension_numbers<[1], [0], [0], [1], [0, 0, 1, 1], [], []>} : vector<64x128xbf16>, vector<128x128xbf16>, vector<64x128xf32> -> vector<64x128xf32>
    %c0_17 = arith.constant 0 : index
    %c0_18 = arith.constant 0 : index
    %23 = vector.load %arg7[%c0_17, %c0_18] : memref<1x128xf32, #tpu.memory_space<vmem>>, vector<1x128xf32>
    %24 = vector.broadcast %23 : vector<1x128xf32> to vector<64x128xf32>
    %25 = arith.addf %22, %24 : vector<64x128xf32>
    %cst_19 = arith.constant 0.000000e+00 : f32
    %cst_20 = arith.constant 2.000000e+01 : f32
    %26 = vector.broadcast %cst_19 : f32 to vector<64x128xf32>
    %27 = arith.maximumf %26, %25 : vector<64x128xf32>
    %28 = vector.broadcast %cst_20 : f32 to vector<64x128xf32>
    %29 = arith.minimumf %28, %27 : vector<64x128xf32>
    %30 = arith.truncf %29 : vector<64x128xf32> to vector<64x128xbf16>
    %c0_21 = arith.constant 0 : index
    %c0_22 = arith.constant 0 : index
    %31 = vector.load %arg8[%c0_21, %c0_22] : memref<64x128xbf16, #tpu.memory_space<vmem>>, vector<64x128xbf16>
    tpu.vector_store %arg8[%c0_21, %c0_22], %30 {strides = array<i32>} : memref<64x128xbf16, #tpu.memory_space<vmem>>, vector<64x128xbf16>,
    return
  }
  func.func @transform_0(%arg0: i32) -> (i32, i32) {
    %c0_i32 = arith.constant 0 : i32
    %c0_i32_0 = arith.constant 0 : i32
    return %arg0, %c0_i32 : i32, i32
  }
  func.func @transform_1(%arg0: i32) -> (i32, i32) {
    %c0_i32 = arith.constant 0 : i32
    %c0_i32_0 = arith.constant 0 : i32
    %c0_i32_1 = arith.constant 0 : i32
    return %c0_i32, %c0_i32_0 : i32, i32
  }
  func.func @transform_2(%arg0: i32) -> (i32, i32) {
    %c0_i32 = arith.constant 0 : i32
    %c0_i32_0 = arith.constant 0 : i32
    %c0_i32_1 = arith.constant 0 : i32
    return %c0_i32, %c0_i32_0 : i32, i32
  }
  func.func @transform_3(%arg0: i32) -> (i32, i32) {
    %c0_i32 = arith.constant 0 : i32
    %c0_i32_0 = arith.constant 0 : i32
    %c0_i32_1 = arith.constant 0 : i32
    return %c0_i32, %c0_i32_0 : i32, i32
  }
  func.func @transform_4(%arg0: i32) -> (i32, i32) {
    %c0_i32 = arith.constant 0 : i32
    %c0_i32_0 = arith.constant 0 : i32
    %c0_i32_1 = arith.constant 0 : i32
    return %c0_i32, %c0_i32_0 : i32, i32
  }
  func.func @transform_5(%arg0: i32) -> (i32, i32) {
    %c0_i32 = arith.constant 0 : i32
    %c0_i32_0 = arith.constant 0 : i32
    %c0_i32_1 = arith.constant 0 : i32
    return %c0_i32, %c0_i32_0 : i32, i32
  }
  func.func @transform_6(%arg0: i32) -> (i32, i32) {
    %c0_i32 = arith.constant 0 : i32
    %c0_i32_0 = arith.constant 0 : i32
    %c0_i32_1 = arith.constant 0 : i32
    return %c0_i32, %c0_i32_0 : i32, i32
  }
  func.func @transform_7(%arg0: i32) -> (i32, i32) {
    %c0_i32 = arith.constant 0 : i32
    %c0_i32_0 = arith.constant 0 : i32
    return %arg0, %c0_i32 : i32, i32
  }
}

module attributes {stable_mosaic.version = 11 : i64} {
  func.func @kernel(%arg0: i32, %arg1: memref<64x128xbf16, #tpu.memory_space<vmem>>, %arg2: memref<128x128xbf16, #tpu.memory_space<vmem>>, %arg3: memref<1x128xf32, #tpu.memory_space<vmem>>, %arg4: memref<128x128xbf16, #tpu.memory_space<vmem>>, %arg5: memref<1x128xf32, #tpu.memory_space<vmem>>, %arg6: memref<128x128xbf16, #tpu.memory_space<vmem>>, %arg7: memref<1x128xf32, #tpu.memory_space<vmem>>, %arg8: memref<64x128xbf16, #tpu.memory_space<vmem>>) attributes {dimension_semantics = [#tpu.dimension_semantics<parallel>], iteration_bounds = array<i64: 1>, scalar_prefetch = 0 : i64, scratch_operands = 0 : i64, tpu.core_type = #tpu.core_type<tc>, window_params = [{transform_indices = @transform_0, window_bounds = array<i64: 64, 128>}, {pipeline_mode = #tpu.pipeline_mode<synchronous>, transform_indices = @transform_1, window_bounds = array<i64: 128, 128>}, {pipeline_mode = #tpu.pipeline_mode<synchronous>, transform_indices = @transform_2, window_bounds = array<i64: 1, 128>}, {pipeline_mode = #tpu.pipeline_mode<synchronous>, transform_indices = @transform_3, window_bounds = array<i64: 128, 128>}, {pipeline_mode = #tpu.pipeline_mode<synchronous>, transform_indices = @transform_4, window_bounds = array<i64: 1, 128>}, {pipeline_mode = #tpu.pipeline_mode<synchronous>, transform_indices = @transform_5, window_bounds = array<i64: 128, 128>}, {pipeline_mode = #tpu.pipeline_mode<synchronous>, transform_indices = @transform_6, window_bounds = array<i64: 1, 128>}, {transform_indices = @transform_7, window_bounds = array<i64: 64, 128>}]} {
    %c0 = arith.constant 0 : index
    %c0_0 = arith.constant 0 : index
    %0 = vector.load %arg1[%c0, %c0_0] : memref<64x128xbf16, #tpu.memory_space<vmem>>, vector<64x128xbf16>
    %c0_1 = arith.constant 0 : index
    %c0_2 = arith.constant 0 : index
    %1 = vector.load %arg2[%c0_1, %c0_2] : memref<128x128xbf16, #tpu.memory_space<vmem>>, vector<128x128xbf16>
    %cst = arith.constant dense<0.000000e+00> : vector<64x128xf32>
    %2 = tpu.matmul %0, %1, %cst {dimension_numbers = #tpu.dot_dimension_numbers<[1], [0], [0], [1], [0, 0, 1, 1], [], []>} : vector<64x128xbf16>, vector<128x128xbf16>, vector<64x128xf32> -> vector<64x128xf32>
    %c0_3 = arith.constant 0 : index
    %c0_4 = arith.constant 0 : index
    %3 = vector.load %arg3[%c0_3, %c0_4] : memref<1x128xf32, #tpu.memory_space<vmem>>, vector<1x128xf32>
    %4 = vector.broadcast %3 : vector<1x128xf32> to vector<64x128xf32>
    %5 = arith.addf %2, %4 : vector<64x128xf32>
    %cst_5 = arith.constant 0.000000e+00 : f32
    %cst_6 = arith.constant 2.000000e+01 : f32
    %6 = vector.broadcast %cst_5 : f32 to vector<64x128xf32>
    %7 = arith.maximumf %6, %5 : vector<64x128xf32>
    %8 = vector.broadcast %cst_6 : f32 to vector<64x128xf32>
    %9 = arith.minimumf %8, %7 : vector<64x128xf32>
    %10 = arith.truncf %9 : vector<64x128xf32> to vector<64x128xbf16>
    %c0_7 = arith.constant 0 : index
    %c0_8 = arith.constant 0 : index
    %11 = vector.load %arg4[%c0_7, %c0_8] : memref<128x128xbf16, #tpu.memory_space<vmem>>, vector<128x128xbf16>
    %cst_9 = arith.constant dense<0.000000e+00> : vector<64x128xf32>
    %12 = tpu.matmul %10, %11, %cst_9 {dimension_numbers = #tpu.dot_dimension_numbers<[1], [0], [0], [1], [0, 0, 1, 1], [], []>} : vector<64x128xbf16>, vector<128x128xbf16>, vector<64x128xf32> -> vector<64x128xf32>
    %c0_10 = arith.constant 0 : index
    %c0_11 = arith.constant 0 : index
    %13 = vector.load %arg5[%c0_10, %c0_11] : memref<1x128xf32, #tpu.memory_space<vmem>>, vector<1x128xf32>
    %14 = vector.broadcast %13 : vector<1x128xf32> to vector<64x128xf32>
    %15 = arith.addf %12, %14 : vector<64x128xf32>
    %cst_12 = arith.constant 0.000000e+00 : f32
    %cst_13 = arith.constant 2.000000e+01 : f32
    %16 = vector.broadcast %cst_12 : f32 to vector<64x128xf32>
    %17 = arith.maximumf %16, %15 : vector<64x128xf32>
    %18 = vector.broadcast %cst_13 : f32 to vector<64x128xf32>
    %19 = arith.minimumf %18, %17 : vector<64x128xf32>
    %20 = arith.truncf %19 : vector<64x128xf32> to vector<64x128xbf16>
    %c0_14 = arith.constant 0 : index
    %c0_15 = arith.constant 0 : index
    %21 = vector.load %arg6[%c0_14, %c0_15] : memref<128x128xbf16, #tpu.memory_space<vmem>>, vector<128x128xbf16>
    %cst_16 = arith.constant dense<0.000000e+00> : vector<64x128xf32>
    %22 = tpu.matmul %20, %21, %cst_16 {dimension_numbers = #tpu.dot_dimension_numbers<[1], [0], [0], [1], [0, 0, 1, 1], [], []>} : vector<64x128xbf16>, vector<128x128xbf16>, vector<64x128xf32> -> vector<64x128xf32>
    %c0_17 = arith.constant 0 : index
    %c0_18 = arith.constant 0 : index
    %23 = vector.load %arg7[%c0_17, %c0_18] : memref<1x128xf32, #tpu.memory_space<vmem>>, vector<1x128xf32>
    %24 = vector.broadcast %23 : vector<1x128xf32> to vector<64x128xf32>
    %25 = arith.addf %22, %24 : vector<64x128xf32>
    %cst_19 = arith.constant 0.000000e+00 : f32
    %cst_20 = arith.constant 2.000000e+01 : f32
    %26 = vector.broadcast %cst_19 : f32 to vector<64x128xf32>
    %27 = arith.maximumf %26, %25 : vector<64x128xf32>
    %28 = vector.broadcast %cst_20 : f32 to vector<64x128xf32>
    %29 = arith.minimumf %28, %27 : vector<64x128xf32>
    %30 = arith.truncf %29 : vector<64x128xf32> to vector<64x128xbf16>
    %c0_21 = arith.constant 0 : index
    %c0_22 = arith.constant 0 : index
    %31 = vector.load %arg8[%c0_21, %c0_22] : memref<64x128xbf16, #tpu.memory_space<vmem>>, vector<64x128xbf16>
    tpu.vector_store %arg8[%c0_21, %c0_22], %30 {strides = array<i32>} : memref<64x128xbf16, #tpu.memory_space<vmem>>, vector<64x128xbf16>,
    return
  }
  func.func @transform_0(%arg0: i32) -> (i32, i32) {
    %c0_i32 = arith.constant 0 : i32
    %c0_i32_0 = arith.constant 0 : i32
    return %arg0, %c0_i32 : i32, i32
  }
  func.func @transform_1(%arg0: i32) -> (i32, i32) {
    %c0_i32 = arith.constant 0 : i32
    %c0_i32_0 = arith.constant 0 : i32
    %c0_i32_1 = arith.constant 0 : i32
    return %c0_i32, %c0_i32_0 : i32, i32
  }
  func.func @transform_2(%arg0: i32) -> (i32, i32) {
    %c0_i32 = arith.constant 0 : i32
    %c0_i32_0 = arith.constant 0 : i32
    %c0_i32_1 = arith.constant 0 : i32
    return %c0_i32, %c0_i32_0 : i32, i32
  }
  func.func @transform_3(%arg0: i32) -> (i32, i32) {
    %c0_i32 = arith.constant 0 : i32
    %c0_i32_0 = arith.constant 0 : i32
    %c0_i32_1 = arith.constant 0 : i32
    return %c0_i32, %c0_i32_0 : i32, i32
  }
  func.func @transform_4(%arg0: i32) -> (i32, i32) {
    %c0_i32 = arith.constant 0 : i32
    %c0_i32_0 = arith.constant 0 : i32
    %c0_i32_1 = arith.constant 0 : i32
    return %c0_i32, %c0_i32_0 : i32, i32
  }
  func.func @transform_5(%arg0: i32) -> (i32, i32) {
    %c0_i32 = arith.constant 0 : i32
    %c0_i32_0 = arith.constant 0 : i32
    %c0_i32_1 = arith.constant 0 : i32
    return %c0_i32, %c0_i32_0 : i32, i32
  }
  func.func @transform_6(%arg0: i32) -> (i32, i32) {
    %c0_i32 = arith.constant 0 : i32
    %c0_i32_0 = arith.constant 0 : i32
    %c0_i32_1 = arith.constant 0 : i32
    return %c0_i32, %c0_i32_0 : i32, i32
  }
  func.func @transform_7(%arg0: i32) -> (i32, i32) {
    %c0_i32 = arith.constant 0 : i32
    %c0_i32_0 = arith.constant 0 : i32
    return %arg0, %c0_i32 : i32, i32
  }
}

</mosaic_0001>

<bundles_post_ra>
// kernel: tpu_custom_call.1
= control target key start
LH: loop header
LB: loop body
LE: loop exit
PB: predicated region body
PF: predicated region fallthrough
CT: control target
= control target key end

     0   :  { %12 = vsyncpa [#allocation3], 0  ;;  %s1130_s0 = inlined_call_operand.hbm [shape: bf16[64,128], index: 0, kind: input, shape index: {}]   ;;  %s1131_s1 = inlined_call_operand.hbm [shape: bf16[128,128], index: 1, kind: input, shape index: {}]   ;;  %s1132_s2 = inlined_call_operand.vmem [shape: f32[1,128], index: 2, kind: input, shape index: {}]   ;;  %s1133_s3 = inlined_call_operand.hbm [shape: bf16[128,128], index: 3, kind: input, shape index: {}]   ;;  %s1134_s4 = inlined_call_operand.vmem [shape: f32[1,128], index: 4, kind: input, shape index: {}]   ;;  %s1135_s5 = inlined_call_operand.hbm [shape: bf16[128,128], index: 5, kind: input, shape index: {}]   ;;  %s1136_s6 = inlined_call_operand.vmem [shape: f32[1,128], index: 6, kind: input, shape index: {}]   ;;  %s1137_s7 = inlined_call_operand.hbm [shape: bf16[64,128], index: 7, kind: output, shape index: {}]  }
   0x1   :  { %13 = vsyncpa [#allocation6], 0 }
   0x2   :  { %14 = vsyncpa [#allocation9], 0 }
   0x3   :  { %15 = vsyncpa [#allocation4], 0  ;;  %s985_s24 = smov [#allocation5]   ;;  %s986_s26 = smov [#allocation2]  }
   0x4   :  { %s33_s25 = sshll.u32 %s985_s24, 4  ;;  %s21_s27 = sshll.u32 %s986_s26, 4  ;;  %s34_s25 = int_to_ptr.vmem [resolvable:$true] %s33_s25  ;;  %s1032_s27 = int_to_ptr.vmem [resolvable:$true] %s21_s27 }
   0x5   :  { %s867_s30 = scalar_lea.hbm %s1131_s1, 1024 }
   0x6   :  { %p868_p0 = scmp.ne.s32.totalorder %s1131_s1, %s867_s30  ;;  %p871_p1 = scmp.lt.u32.totalorder %s867_s30, %s1131_s1 }
   0x8   :  { %p873_p2 = pnand %p871_p1, %p868_p0 }
   0xa   :  { %876 = shalt.err (!%p873_p2)
}
   0xb   :  { %s877_s12 = scalar_lea.vmem %s34_s25, 1024  ;;  %p882_p4 = scmp.lt.s32.totalorder %s34_s25, %s34_s25 }
   0xc   :  { %p878_p3 = scmp.ne.s32.totalorder %s34_s25, %s877_s12  ;;  %p883_p5 = scmp.lt.s32.totalorder %s877_s12, %s877_s12 }
   0xe   :  { %p884_p6 = por %p883_p5, %p882_p4 }
  0x10   :  { %p885_p7 = pnand %p884_p6, %p878_p3 }
  0x12   :  { %888 = shalt.err (!%p885_p7)
}
  0x13   :  { %s987_s13 = smov 64   ;;  %s988_s14 = smov 4  }
  0x14   :  { %39 = dma.hbm_to_vmem [thread:$0]  %s1131_s1, 1024, %s34_s25, [#allocation6], %s987_s13, %s987_s13, %s988_s14  }
  0x15   :  { %s889_s19 = scalar_lea.hbm %s1130_s0, 512 }
  0x16   :  { %p890_p8 = scmp.ne.s32.totalorder %s1130_s0, %s889_s19  ;;  %p893_p9 = scmp.lt.u32.totalorder %s889_s19, %s1130_s0 }
  0x18   :  { %p895_p10 = pnand %p893_p9, %p890_p8 }
  0x1a   :  { %898 = shalt.err (!%p895_p10)
}
  0x1b   :  { %s899_s24 = scalar_lea.vmem %s1032_s27, 512  ;;  %p904_p12 = scmp.lt.s32.totalorder %s1032_s27, %s1032_s27 }
  0x1c   :  { %p900_p11 = scmp.ne.s32.totalorder %s1032_s27, %s899_s24  ;;  %p905_p13 = scmp.lt.s32.totalorder %s899_s24, %s899_s24 }
  0x1e   :  { %p906_p0 = por %p905_p13, %p904_p12 }
  0x20   :  { %p907_p1 = pnand %p906_p0, %p900_p11 }
  0x22   :  { %910 = shalt.err (!%p907_p1)
}
  0x23   :  { %27 = dma.hbm_to_vmem [thread:$0]  %s1130_s0, 512, %s1032_s27, [#allocation3], %s987_s13, %s987_s13, %s988_s14  }
  0x24   :  { %s989_s26 = smov [#allocation7]   ;;  %s990_s29 = smov [#allocation8]  }
  0x25   :  { %s47_s28 = sshll.u32 %s989_s26, 4  ;;  %s61_s30 = sshll.u32 %s990_s29, 4  ;;  %s48_s28 = int_to_ptr.vmem [resolvable:$true] %s47_s28  ;;  %s1069_s30 = int_to_ptr.vmem [resolvable:$true] %s61_s30 }
  0x26   :  { %s911_s10 = scalar_lea.hbm %s1133_s3, 1024 }
  0x27   :  { %p912_p2 = scmp.ne.s32.totalorder %s1133_s3, %s911_s10  ;;  %p915_p3 = scmp.lt.u32.totalorder %s911_s10, %s1133_s3 }
  0x29   :  { %p917_p4 = pnand %p915_p3, %p912_p2 }
  0x2b   :  { %920 = shalt.err (!%p917_p4)
}
  0x2c   :  { %s921_s0 = scalar_lea.vmem %s48_s28, 1024  ;;  %p926_p6 = scmp.lt.s32.totalorder %s48_s28, %s48_s28 }
  0x2d   :  { %p922_p5 = scmp.ne.s32.totalorder %s48_s28, %s921_s0  ;;  %p927_p7 = scmp.lt.s32.totalorder %s921_s0, %s921_s0 }
  0x2f   :  { %p928_p8 = por %p927_p7, %p926_p6 }
  0x31   :  { %p929_p9 = pnand %p928_p8, %p922_p5 }
  0x33   :  { %932 = shalt.err (!%p929_p9)
}
  0x34   :  { %53 = dma.hbm_to_vmem [thread:$0]  %s1133_s3, 1024, %s48_s28, [#allocation6], %s987_s13, %s987_s13, %s988_s14  }
  0x35   :  { %s933_s20 = scalar_lea.hbm %s1135_s5, 1024 }
  0x36   :  { %p934_p10 = scmp.ne.s32.totalorder %s1135_s5, %s933_s20  ;;  %p937_p11 = scmp.lt.u32.totalorder %s933_s20, %s1135_s5 }
  0x38   :  { %p939_p12 = pnand %p937_p11, %p934_p10 }
  0x3a   :  { %942 = shalt.err (!%p939_p12)
}
  0x3b   :  { %s943_s1 = scalar_lea.vmem %s1069_s30, 1024  ;;  %p948_p0 = scmp.lt.s32.totalorder %s1069_s30, %s1069_s30 }
  0x3c   :  { %p944_p13 = scmp.ne.s32.totalorder %s1069_s30, %s943_s1  ;;  %p949_p1 = scmp.lt.s32.totalorder %s943_s1, %s943_s1 }
  0x3e   :  { %p950_p2 = por %p949_p1, %p948_p0 }
  0x40   :  { %p951_p3 = pnand %p950_p2, %p944_p13 }
  0x42   :  { %954 = shalt.err (!%p951_p3)
}
  0x43   :  { %67 = dma.hbm_to_vmem [thread:$0]  %s1135_s5, 1024, %s1069_s30, [#allocation9], %s987_s13, %s987_s13, %s988_s14  }
  0x44   :  { %977 = dma.done.wait [#allocation3], 512  }
  0x45   :  { %978 = vsyncadd [#allocation3], 4294966784 }
  0x46   :  { %979 = dma.done.wait [#allocation6], 2048  }
  0x47   :  { %980 = vsyncadd [#allocation6], 4294965248 }
  0x48   :  { %981 = dma.done.wait [#allocation9], 1024  }
  0x49   :  { %982 = vsyncadd [#allocation9], 4294966272  ;;  %v839_v0 = vld [vmem:[#allocation5] sm:$0xff]   ;;  %v840_v1 = vld [vmem:[#allocation5 + $0x8] sm:$0xff]  }
  0x4a   :  { %744 = vmatprep.subr.bf16.mxu0 %v839_v0  ;;  %v841_v2 = vld [vmem:[#allocation5 + $0x10] sm:$0xff]   ;;  %v842_v3 = vld [vmem:[#allocation5 + $0x18] sm:$0xff]   ;;  %v847_v4 = vld [vmem:[#allocation2] sm:$0xff]  }
  0x4b   :  { %745 = vmatpush3.bf16.msra.mxu0 %v839_v0  ;;  %760 = vmatprep.mubr.bf16.mxu0 %v847_v4  ;;  %v843_v5 = vld [vmem:[#allocation5 + $0x20] sm:$0xff]   ;;  %v852_v7 = vld [vmem:[#allocation7 + $0x8] sm:$0xff]   ;;  %v853_v9 = vld [vmem:[#allocation7 + $0x10] sm:$0xff]  }
  0x4c   :  { %746 = vmatprep.subr.bf16.mxu0 %v840_v1  ;;  %v851_v6 = vld [vmem:[#allocation7] sm:$0xff]   ;;  %v844_v8 = vld [vmem:[#allocation5 + $0x28] sm:$0xff]   ;;  %v845_v10 = vld [vmem:[#allocation5 + $0x30] sm:$0xff]  }
  0x4d   :  { %768 = vmatprep.subr.bf16.mxu1 %v851_v6  ;;  %v854_v11 = vld [vmem:[#allocation7 + $0x18] sm:$0xff]   ;;  %v855_v13 = vld [vmem:[#allocation7 + $0x20] sm:$0xff]   ;;  %v848_v14 = vld [vmem:[#allocation2 + $0x8] sm:$0xff]  }
  0x4e   :  { %769 = vmatpush3.bf16.msra.mxu1 %v851_v6  ;;  %v846_v12 = vld [vmem:[#allocation5 + $0x38] sm:$0xff]   ;;  %v849_v15 = vld [vmem:[#allocation2 + $0x10] sm:$0xff]   ;;  %v856_v17 = vld [vmem:[#allocation7 + $0x28] sm:$0xff]  }
  0x4f   :  { %747 = vmatpush3.bf16.msra.mxu0 %v840_v1  ;;  %770 = vmatprep.subr.bf16.mxu1 %v852_v7  ;;  %v850_v16 = vld [vmem:[#allocation2 + $0x18] sm:$0xff]   ;;  %v857_v18 = vld [vmem:[#allocation7 + $0x30] sm:$0xff]   ;;  %v859_v20 = vld [vmem:[#allocation8] sm:$0xff]  }
  0x50   :  { %748 = vmatprep.subr.bf16.mxu0 %v841_v2  ;;  %v858_v19 = vld [vmem:[#allocation7 + $0x38] sm:$0xff]   ;;  %v860_v21 = vld [vmem:[#allocation8 + $0x8] sm:$0xff]   ;;  %v861_v22 = vld [vmem:[#allocation8 + $0x10] sm:$0xff]  }
  0x51   :  { %v862_v23 = vld [vmem:[#allocation8 + $0x18] sm:$0xff]   ;;  %v863_v24 = vld [vmem:[#allocation8 + $0x20] sm:$0xff]   ;;  %v864_v62 = vld [vmem:[#allocation8 + $0x28] sm:$0xff]  }
  0x52   :  { %771 = vmatpush3.bf16.msra.mxu1 %v852_v7  ;;  %v638_v25 = vld [vmem:[%s1132_s2] ss:$0 sm:$0xff]  ;;  %v865_v63 = vld [vmem:[#allocation8 + $0x30] sm:$0xff]   ;;  %v866_v0 = vld [vmem:[#allocation8 + $0x38] sm:$0xff]  }
  0x53   :  { %749 = vmatpush3.bf16.msra.mxu0 %v841_v2  ;;  %772 = vmatprep.subr.bf16.mxu1 %v853_v9  ;;  %v651_v1 = vld [vmem:[%s1134_s4] ss:$0 sm:$0xff] }
  0x54   :  { %750 = vmatprep.subr.bf16.mxu0 %v842_v3 }
  0x56   :  { %773 = vmatpush3.bf16.msra.mxu1 %v853_v9 }
  0x57   :  { %751 = vmatpush3.bf16.msra.mxu0 %v842_v3  ;;  %774 = vmatprep.subr.bf16.mxu1 %v854_v11 }
  0x58   :  { %752 = vmatprep.subr.bf16.mxu0 %v843_v5 }
  0x5a   :  { %775 = vmatpush3.bf16.msra.mxu1 %v854_v11 }
  0x5b   :  { %753 = vmatpush3.bf16.msra.mxu0 %v843_v5  ;;  %776 = vmatprep.subr.bf16.mxu1 %v855_v13 }
  0x5c   :  { %754 = vmatprep.subr.bf16.mxu0 %v844_v8 }
  0x5e   :  { %777 = vmatpush3.bf16.msra.mxu1 %v855_v13 }
  0x5f   :  { %755 = vmatpush3.bf16.msra.mxu0 %v844_v8  ;;  %778 = vmatprep.subr.bf16.mxu1 %v856_v17 }
  0x60   :  { %756 = vmatprep.subr.bf16.mxu0 %v845_v10 }
  0x62   :  { %779 = vmatpush3.bf16.msra.mxu1 %v856_v17 }
  0x63   :  { %757 = vmatpush3.bf16.msra.mxu0 %v845_v10  ;;  %780 = vmatprep.subr.bf16.mxu1 %v857_v18 }
  0x64   :  { %758 = vmatprep.subr.bf16.mxu0 %v846_v12 }
  0x66   :  { %781 = vmatpush3.bf16.msra.mxu1 %v857_v18 }
  0x67   :  { %759 = vmatpush3.bf16.msra.mxu0 %v846_v12  ;;  %782 = vmatprep.subr.bf16.mxu1 %v858_v19 }
  0x68   :  { %792 = vmatprep.subr.bf16.mxu0 %v859_v20 }
  0x6a   :  { %761 = vmatmul.mubr.bf16.vlgmr.msra.gmra.mrb[0].mxu0 %v848_v14  ;;  %783 = vmatpush3.bf16.msra.mxu1 %v858_v19 }
  0x6b   :  { %764 = vmatprep.mubr.bf16.mxu0 %v849_v15  ;;  %816 = vmatprep.subr.bf16.mxu1 %v859_v20 }
  0x6c   :  { %793 = vmatpush3.bf16.msra.mxu0 %v859_v20 }
  0x6d   :  { %794 = vmatprep.subr.bf16.mxu0 %v860_v21 }
  0x70   :  { %795 = vmatpush3.bf16.msra.mxu0 %v860_v21 }
  0x71   :  { %796 = vmatprep.subr.bf16.mxu0 %v861_v22 }
  0x72   :  { %765 = vmatmul.mubr.bf16.gmra.mrb[4].mxu0 %v850_v16 }
  0x74   :  { %797 = vmatpush3.bf16.msra.mxu0 %v861_v22 }
  0x75   :  { %798 = vmatprep.subr.bf16.mxu0 %v862_v23 }
  0x78   :  { %799 = vmatpush3.bf16.msra.mxu0 %v862_v23 }
  0x79   :  { %800 = vmatprep.subr.bf16.mxu0 %v863_v24 }
  0x7c   :  { %801 = vmatpush3.bf16.msra.mxu0 %v863_v24 }
  0x7d   :  { %802 = vmatprep.subr.bf16.mxu0 %v864_v62 }
  0x80   :  { %803 = vmatpush3.bf16.msra.mxu0 %v864_v62 }
  0x81   :  { %804 = vmatprep.subr.bf16.mxu0 %v865_v63 }
  0x84   :  { %805 = vmatpush3.bf16.msra.mxu0 %v865_v63 }
  0x85   :  { %806 = vmatprep.subr.bf16.mxu0 %v866_v0 }
  0x88   :  { %807 = vmatpush3.bf16.msra.mxu0 %v866_v0 }
 0x13d   :  { %v762_v26 = vpop.f32.mrb[0].mxu0 }
 0x13e   :  { %v229_v27 = vadd.f32 %v762_v26, %v638_v25  ;;  %v220_v28 = vpop.f32.mrb[1].mxu0 }
 0x13f   :  { %v221_v29 = vadd.f32 %v638_v25, %v220_v28  ;;  %v763_v30 = vpop.f32.mrb[2].mxu0 }
 0x140   :  { %v253_v31 = vmax.f32 %v229_v27, 0.0  ;;  %v232_v32 = vadd.f32 %v763_v30, %v638_v25  ;;  %v223_v33 = vpop.f32.mrb[3].mxu0 }
 0x141   :  { %v251_v34 = vmax.f32 %v221_v29, 0.0  ;;  %v224_v35 = vadd.f32 %v638_v25, %v223_v33 }
 0x142   :  { %v254_v36 = vmax.f32 %v232_v32, 0.0  ;;  %v261_v38 = vmin.f32 %v253_v31, 20.0 }
 0x143   :  { %v252_v37 = vmax.f32 %v224_v35, 0.0  ;;  %v259_v40 = vmin.f32 %v251_v34, 20.0 }
 0x144   :  { %v262_v39 = vmin.f32 %v254_v36, 20.0 }
 0x145   :  { %v260_v41 = vmin.f32 %v252_v37, 20.0  ;;  %v766_v42 = vpop.f32.mrb[4].mxu0 }
 0x146   :  { %v268_v43 = vpack.c.bf16 %v262_v39, %v261_v38  ;;  %v245_v44 = vadd.f32 %v766_v42, %v638_v25  ;;  %v236_v45 = vpop.f32.mrb[5].mxu0  ;;  %v660_v38 = vld [vmem:[%s1136_s6] ss:$0 sm:$0xff]  ;;  %s991_s6 = smov [#allocation10]  }
 0x147   :  { %v237_v46 = vadd.f32 %v638_v25, %v236_v45  ;;  %v767_v47 = vpop.f32.mrb[6].mxu0  ;;  %v267_v48 = vpack.c.bf16 %v260_v41, %v259_v40  ;;  %s624_s30 = sshll.u32 %s991_s6, 4  ;;  %s625_s30 = int_to_ptr.vmem [resolvable:$true] %s624_s30 }
 0x148   :  { %v257_v49 = vmax.f32 %v245_v44, 0.0  ;;  %v248_v50 = vadd.f32 %v767_v47, %v638_v25  ;;  %v239_v51 = vpop.f32.mrb[7].mxu0  ;;  %s955_s8 = scalar_lea.vmem %s625_s30, 512  ;;  %p960_p5 = scmp.lt.s32.totalorder %s625_s30, %s625_s30 }
 0x149   :  { %v255_v52 = vmax.f32 %v237_v46, 0.0  ;;  %v240_v53 = vadd.f32 %v638_v25, %v239_v51  ;;  %784 = vmatprep.mubr.bf16.mxu1 %v267_v48  ;;  %p956_p4 = scmp.ne.s32.totalorder %s625_s30, %s955_s8  ;;  %p961_p6 = scmp.lt.s32.totalorder %s955_s8, %s955_s8 }
 0x14a   :  { %v258_v54 = vmax.f32 %v248_v50, 0.0  ;;  %785 = vmatmul.mubr.bf16.vlgmr.msra.gmra.mrb[0].mxu1 %v268_v43  ;;  %v265_v56 = vmin.f32 %v257_v49, 20.0 }
 0x14b   :  { %v256_v55 = vmax.f32 %v240_v53, 0.0  ;;  %824 = vmatpush3.bf16.msra.mxu1 %v859_v20  ;;  %v263_v58 = vmin.f32 %v255_v52, 20.0  ;;  %p962_p7 = por %p961_p6, %p960_p5 }
 0x14c   :  { %v266_v57 = vmin.f32 %v258_v54, 20.0  ;;  %817 = vmatprep.subr.bf16.mxu1 %v860_v21 }
 0x14d   :  { %v264_v59 = vmin.f32 %v256_v55, 20.0  ;;  %p963_p8 = pnand %p962_p7, %p956_p4 }
 0x14e   :  { %v270_v60 = vpack.c.bf16 %v266_v57, %v265_v56 }
 0x14f   :  { %v269_v61 = vpack.c.bf16 %v264_v59, %v263_v58  ;;  %825 = vmatpush3.bf16.msra.mxu1 %v860_v21 }
 0x150   :  { %818 = vmatprep.subr.bf16.mxu1 %v861_v22 }
 0x151   :  { %788 = vmatprep.mubr.bf16.mxu1 %v269_v61 }
 0x152   :  { %789 = vmatmul.mubr.bf16.gmra.mrb[4].mxu1 %v270_v60 }
 0x153   :  { %826 = vmatpush3.bf16.msra.mxu1 %v861_v22 }
 0x154   :  { %819 = vmatprep.subr.bf16.mxu1 %v862_v23 }
 0x157   :  { %827 = vmatpush3.bf16.msra.mxu1 %v862_v23 }
 0x158   :  { %820 = vmatprep.subr.bf16.mxu1 %v863_v24 }
 0x15b   :  { %828 = vmatpush3.bf16.msra.mxu1 %v863_v24 }
 0x15c   :  { %821 = vmatprep.subr.bf16.mxu1 %v864_v62 }
 0x15f   :  { %829 = vmatpush3.bf16.msra.mxu1 %v864_v62 }
 0x160   :  { %822 = vmatprep.subr.bf16.mxu1 %v865_v63 }
 0x163   :  { %830 = vmatpush3.bf16.msra.mxu1 %v865_v63 }
 0x164   :  { %823 = vmatprep.subr.bf16.mxu1 %v866_v0 }
 0x167   :  { %831 = vmatpush3.bf16.msra.mxu1 %v866_v0 }
 0x21d   :  { %v786_v2 = vpop.f32.mrb[0].mxu1 }
 0x21e   :  { %v385_v3 = vadd.f32 %v786_v2, %v651_v1  ;;  %v376_v4 = vpop.f32.mrb[1].mxu1 }
 0x21f   :  { %v377_v5 = vadd.f32 %v651_v1, %v376_v4  ;;  %v787_v6 = vpop.f32.mrb[2].mxu1 }
 0x220   :  { %v409_v7 = vmax.f32 %v385_v3, 0.0  ;;  %v388_v8 = vadd.f32 %v787_v6, %v651_v1  ;;  %v379_v9 = vpop.f32.mrb[3].mxu1 }
 0x221   :  { %v407_v10 = vmax.f32 %v377_v5, 0.0  ;;  %v380_v11 = vadd.f32 %v651_v1, %v379_v9 }
 0x222   :  { %v410_v12 = vmax.f32 %v388_v8, 0.0  ;;  %v417_v14 = vmin.f32 %v409_v7, 20.0 }
 0x223   :  { %v408_v13 = vmax.f32 %v380_v11, 0.0  ;;  %v415_v16 = vmin.f32 %v407_v10, 20.0 }
 0x224   :  { %v418_v15 = vmin.f32 %v410_v12, 20.0 }
 0x225   :  { %v416_v17 = vmin.f32 %v408_v13, 20.0  ;;  %v790_v18 = vpop.f32.mrb[4].mxu1 }
 0x226   :  { %v424_v19 = vpack.c.bf16 %v418_v15, %v417_v14  ;;  %v401_v20 = vadd.f32 %v790_v18, %v651_v1  ;;  %v392_v21 = vpop.f32.mrb[5].mxu1 }
 0x227   :  { %v423_v22 = vpack.c.bf16 %v416_v17, %v415_v16  ;;  %v393_v23 = vadd.f32 %v651_v1, %v392_v21  ;;  %v791_v24 = vpop.f32.mrb[6].mxu1 }
 0x228   :  { %v413_v25 = vmax.f32 %v401_v20, 0.0  ;;  %v404_v26 = vadd.f32 %v791_v24, %v651_v1  ;;  %v395_v27 = vpop.f32.mrb[7].mxu1 }
 0x229   :  { %v411_v28 = vmax.f32 %v393_v23, 0.0  ;;  %v396_v29 = vadd.f32 %v651_v1, %v395_v27  ;;  %808 = vmatprep.mubr.bf16.mxu0 %v423_v22 }
 0x22a   :  { %v414_v30 = vmax.f32 %v404_v26, 0.0  ;;  %809 = vmatmul.mubr.bf16.vlgmr.msra.gmra.mrb[8].mxu0 %v424_v19  ;;  %v421_v32 = vmin.f32 %v413_v25, 20.0 }
 0x22b   :  { %v412_v31 = vmax.f32 %v396_v29, 0.0  ;;  %v419_v34 = vmin.f32 %v411_v28, 20.0 }
 0x22c   :  { %v422_v33 = vmin.f32 %v414_v30, 20.0 }
 0x22d   :  { %v420_v35 = vmin.f32 %v412_v31, 20.0 }
 0x22e   :  { %v426_v36 = vpack.c.bf16 %v422_v33, %v421_v32 }
 0x22f   :  { %v425_v37 = vpack.c.bf16 %v420_v35, %v419_v34 }
 0x231   :  { %812 = vmatprep.mubr.bf16.mxu1 %v425_v37 }
 0x232   :  { %813 = vmatmul.mubr.bf16.vlgmr.msra.gmra.mrb[8].mxu1 %v426_v36 }
 0x2fd   :  { %v810_v39 = vpop.f32.mrb[8].mxu0 }
 0x2fe   :  { %v541_v40 = vadd.f32 %v810_v39, %v660_v38  ;;  %v532_v41 = vpop.f32.mrb[9].mxu0 }
 0x2ff   :  { %v533_v42 = vadd.f32 %v660_v38, %v532_v41  ;;  %v811_v43 = vpop.f32.mrb[10].mxu0 }
 0x300   :  { %v565_v44 = vmax.f32 %v541_v40, 0.0  ;;  %v544_v45 = vadd.f32 %v811_v43, %v660_v38  ;;  %v535_v46 = vpop.f32.mrb[11].mxu0 }
 0x301   :  { %v563_v47 = vmax.f32 %v533_v42, 0.0  ;;  %v536_v48 = vadd.f32 %v660_v38, %v535_v46 }
 0x302   :  { %v566_v49 = vmax.f32 %v544_v45, 0.0  ;;  %v573_v51 = vmin.f32 %v565_v44, 20.0 }
 0x303   :  { %v564_v50 = vmax.f32 %v536_v48, 0.0  ;;  %v571_v53 = vmin.f32 %v563_v47, 20.0 }
 0x304   :  { %v574_v52 = vmin.f32 %v566_v49, 20.0 }
 0x305   :  { %v572_v54 = vmin.f32 %v564_v50, 20.0  ;;  %v814_v55 = vpop.f32.mrb[8].mxu1 }
 0x306   :  { %v693_v56 = vpack.c.bf16 %v574_v52, %v573_v51  ;;  %v557_v57 = vadd.f32 %v814_v55, %v660_v38  ;;  %v548_v58 = vpop.f32.mrb[9].mxu1 }
 0x307   :  { %v688_v59 = vpack.c.bf16 %v572_v54, %v571_v53  ;;  %v549_v60 = vadd.f32 %v660_v38, %v548_v58  ;;  %v815_v61 = vpop.f32.mrb[10].mxu1 }
 0x308   :  { %705 = vst [vmem:[#allocation10 + $0x8] sm:$0xff] %v693_v56   ;;  %v569_v62 = vmax.f32 %v557_v57, 0.0  ;;  %v560_v63 = vadd.f32 %v815_v61, %v660_v38  ;;  %v551_v0 = vpop.f32.mrb[11].mxu1 }
 0x309   :  { %689 = vst [vmem:[#allocation10] sm:$0xff] %v688_v59   ;;  %v567_v1 = vmax.f32 %v549_v60, 0.0  ;;  %v552_v2 = vadd.f32 %v660_v38, %v551_v0 }
 0x30a   :  { %v570_v3 = vmax.f32 %v560_v63, 0.0  ;;  %v577_v5 = vmin.f32 %v569_v62, 20.0 }
 0x30b   :  { %v568_v4 = vmax.f32 %v552_v2, 0.0  ;;  %v575_v7 = vmin.f32 %v567_v1, 20.0 }
 0x30c   :  { %v578_v6 = vmin.f32 %v570_v3, 20.0 }
 0x30d   :  { %v576_v8 = vmin.f32 %v568_v4, 20.0 }
 0x30e   :  { %v703_v9 = vpack.c.bf16 %v578_v6, %v577_v5 }
 0x30f   :  { %v698_v10 = vpack.c.bf16 %v576_v8, %v575_v7 }
 0x310   :  { %707 = vst [vmem:[#allocation10 + $0x18] sm:$0xff] %v703_v9  }
 0x311   :  { %706 = vst [vmem:[#allocation10 + $0x10] sm:$0xff] %v698_v10  }
 0x312   :  { %966 = shalt.err (!%p963_p8)
}
 0x313   :  { %s967_s11 = scalar_lea.hbm %s1137_s7, 512 }
 0x314   :  { %p968_p9 = scmp.ne.s32.totalorder %s1137_s7, %s967_s11  ;;  %p971_p10 = scmp.lt.u32.totalorder %s967_s11, %s1137_s7 }
 0x316   :  { %p973_p11 = pnand %p971_p10, %p968_p9 }
 0x318   :  { %976 = shalt.err (!%p973_p11)
}
 0x319   :  { %630 = dma.vmem_to_hbm [thread:$0]  %s625_s30, 512, %s1137_s7, [#allocation4], %s987_s13, %s987_s13, %s988_s14  }
 0x31a   :  { %983 = dma.done.wait [#allocation4], 512  }
 0x31b   :  { %984 = vsyncadd [#allocation4], 4294966784 }
 0x31c   :  { %634 = vsyncpa [#allocation3], 1 }
 0x31d   :  { %635 = vsyncpa [#allocation6], 1 }
 0x31e   :  { %636 = vsyncpa [#allocation9], 1 }
 0x31f   :  { %637 = vsyncpa [#allocation4], 1 }

// kernel: tpu_custom_call.1
= control target key start
LH: loop header
LB: loop body
LE: loop exit
PB: predicated region body
PF: predicated region fallthrough
CT: control target
= control target key end

     0   :  { %12 = vsyncpa [#allocation3], 0  ;;  %s1130_s0 = inlined_call_operand.hbm [shape: bf16[64,128], index: 0, kind: input, shape index: {}]   ;;  %s1131_s1 = inlined_call_operand.hbm [shape: bf16[128,128], index: 1, kind: input, shape index: {}]   ;;  %s1132_s2 = inlined_call_operand.vmem [shape: f32[1,128], index: 2, kind: input, shape index: {}]   ;;  %s1133_s3 = inlined_call_operand.hbm [shape: bf16[128,128], index: 3, kind: input, shape index: {}]   ;;  %s1134_s4 = inlined_call_operand.vmem [shape: f32[1,128], index: 4, kind: input, shape index: {}]   ;;  %s1135_s5 = inlined_call_operand.hbm [shape: bf16[128,128], index: 5, kind: input, shape index: {}]   ;;  %s1136_s6 = inlined_call_operand.vmem [shape: f32[1,128], index: 6, kind: input, shape index: {}]   ;;  %s1137_s7 = inlined_call_operand.hbm [shape: bf16[64,128], index: 7, kind: output, shape index: {}]  }
   0x1   :  { %13 = vsyncpa [#allocation6], 0 }
   0x2   :  { %14 = vsyncpa [#allocation9], 0 }
   0x3   :  { %15 = vsyncpa [#allocation4], 0  ;;  %s985_s24 = smov [#allocation5]   ;;  %s986_s26 = smov [#allocation2]  }
   0x4   :  { %s33_s25 = sshll.u32 %s985_s24, 4  ;;  %s21_s27 = sshll.u32 %s986_s26, 4  ;;  %s34_s25 = int_to_ptr.vmem [resolvable:$true] %s33_s25  ;;  %s1032_s27 = int_to_ptr.vmem [resolvable:$true] %s21_s27 }
   0x5   :  { %s867_s30 = scalar_lea.hbm %s1131_s1, 1024 }
   0x6   :  { %p868_p0 = scmp.ne.s32.totalorder %s1131_s1, %s867_s30  ;;  %p871_p1 = scmp.lt.u32.totalorder %s867_s30, %s1131_s1 }
   0x8   :  { %p873_p2 = pnand %p871_p1, %p868_p0 }
   0xa   :  { %876 = shalt.err (!%p873_p2)
}
   0xb   :  { %s877_s12 = scalar_lea.vmem %s34_s25, 1024  ;;  %p882_p4 = scmp.lt.s32.totalorder %s34_s25, %s34_s25 }
   0xc   :  { %p878_p3 = scmp.ne.s32.totalorder %s34_s25, %s877_s12  ;;  %p883_p5 = scmp.lt.s32.totalorder %s877_s12, %s877_s12 }
   0xe   :  { %p884_p6 = por %p883_p5, %p882_p4 }
  0x10   :  { %p885_p7 = pnand %p884_p6, %p878_p3 }
  0x12   :  { %888 = shalt.err (!%p885_p7)
}
  0x13   :  { %s987_s13 = smov 64   ;;  %s988_s14 = smov 4  }
  0x14   :  { %39 = dma.hbm_to_vmem [thread:$0]  %s1131_s1, 1024, %s34_s25, [#allocation6], %s987_s13, %s987_s13, %s988_s14  }
  0x15   :  { %s889_s19 = scalar_lea.hbm %s1130_s0, 512 }
  0x16   :  { %p890_p8 = scmp.ne.s32.totalorder %s1130_s0, %s889_s19  ;;  %p893_p9 = scmp.lt.u32.totalorder %s889_s19, %s1130_s0 }
  0x18   :  { %p895_p10 = pnand %p893_p9, %p890_p8 }
  0x1a   :  { %898 = shalt.err (!%p895_p10)
}
  0x1b   :  { %s899_s24 = scalar_lea.vmem %s1032_s27, 512  ;;  %p904_p12 = scmp.lt.s32.totalorder %s1032_s27, %s1032_s27 }
  0x1c   :  { %p900_p11 = scmp.ne.s32.totalorder %s1032_s27, %s899_s24  ;;  %p905_p13 = scmp.lt.s32.totalorder %s899_s24, %s899_s24 }
  0x1e   :  { %p906_p0 = por %p905_p13, %p904_p12 }
  0x20   :  { %p907_p1 = pnand %p906_p0, %p900_p11 }
  0x22   :  { %910 = shalt.err (!%p907_p1)
}
  0x23   :  { %27 = dma.hbm_to_vmem [thread:$0]  %s1130_s0, 512, %s1032_s27, [#allocation3], %s987_s13, %s987_s13, %s988_s14  }
  0x24   :  { %s989_s26 = smov [#allocation7]   ;;  %s990_s29 = smov [#allocation8]  }
  0x25   :  { %s47_s28 = sshll.u32 %s989_s26, 4  ;;  %s61_s30 = sshll.u32 %s990_s29, 4  ;;  %s48_s28 = int_to_ptr.vmem [resolvable:$true] %s47_s28  ;;  %s1069_s30 = int_to_ptr.vmem [resolvable:$true] %s61_s30 }
  0x26   :  { %s911_s10 = scalar_lea.hbm %s1133_s3, 1024 }
  0x27   :  { %p912_p2 = scmp.ne.s32.totalorder %s1133_s3, %s911_s10  ;;  %p915_p3 = scmp.lt.u32.totalorder %s911_s10, %s1133_s3 }
  0x29   :  { %p917_p4 = pnand %p915_p3, %p912_p2 }
  0x2b   :  { %920 = shalt.err (!%p917_p4)
}
  0x2c   :  { %s921_s0 = scalar_lea.vmem %s48_s28, 1024  ;;  %p926_p6 = scmp.lt.s32.totalorder %s48_s28, %s48_s28 }
  0x2d   :  { %p922_p5 = scmp.ne.s32.totalorder %s48_s28, %s921_s0  ;;  %p927_p7 = scmp.lt.s32.totalorder %s921_s0, %s921_s0 }
  0x2f   :  { %p928_p8 = por %p927_p7, %p926_p6 }
  0x31   :  { %p929_p9 = pnand %p928_p8, %p922_p5 }
  0x33   :  { %932 = shalt.err (!%p929_p9)
}
  0x34   :  { %53 = dma.hbm_to_vmem [thread:$0]  %s1133_s3, 1024, %s48_s28, [#allocation6], %s987_s13, %s987_s13, %s988_s14  }
  0x35   :  { %s933_s20 = scalar_lea.hbm %s1135_s5, 1024 }
  0x36   :  { %p934_p10 = scmp.ne.s32.totalorder %s1135_s5, %s933_s20  ;;  %p937_p11 = scmp.lt.u32.totalorder %s933_s20, %s1135_s5 }
  0x38   :  { %p939_p12 = pnand %p937_p11, %p934_p10 }
  0x3a   :  { %942 = shalt.err (!%p939_p12)
}
  0x3b   :  { %s943_s1 = scalar_lea.vmem %s1069_s30, 1024  ;;  %p948_p0 = scmp.lt.s32.totalorder %s1069_s30, %s1069_s30 }
  0x3c   :  { %p944_p13 = scmp.ne.s32.totalorder %s1069_s30, %s943_s1  ;;  %p949_p1 = scmp.lt.s32.totalorder %s943_s1, %s943_s1 }
  0x3e   :  { %p950_p2 = por %p949_p1, %p948_p0 }
  0x40   :  { %p951_p3 = pnand %p950_p2, %p944_p13 }
  0x42   :  { %954 = shalt.err (!%p951_p3)
}
  0x43   :  { %67 = dma.hbm_to_vmem [thread:$0]  %s1135_s5, 1024, %s1069_s30, [#allocation9], %s987_s13, %s987_s13, %s988_s14  }
  0x44   :  { %977 = dma.done.wait [#allocation3], 512  }
  0x45   :  { %978 = vsyncadd [#allocation3], 4294966784 }
  0x46   :  { %979 = dma.done.wait [#allocation6], 2048  }
  0x47   :  { %980 = vsyncadd [#allocation6], 4294965248 }
  0x48   :  { %981 = dma.done.wait [#allocation9], 1024  }
  0x49   :  { %982 = vsyncadd [#allocation9], 4294966272  ;;  %v839_v0 = vld [vmem:[#allocation5] sm:$0xff]   ;;  %v840_v1 = vld [vmem:[#allocation5 + $0x8] sm:$0xff]  }
  0x4a   :  { %744 = vmatprep.subr.bf16.mxu0 %v839_v0  ;;  %v841_v2 = vld [vmem:[#allocation5 + $0x10] sm:$0xff]   ;;  %v842_v3 = vld [vmem:[#allocation5 + $0x18] sm:$0xff]   ;;  %v847_v4 = vld [vmem:[#allocation2] sm:$0xff]  }
  0x4b   :  { %745 = vmatpush3.bf16.msra.mxu0 %v839_v0  ;;  %760 = vmatprep.mubr.bf16.mxu0 %v847_v4  ;;  %v843_v5 = vld [vmem:[#allocation5 + $0x20] sm:$0xff]   ;;  %v852_v7 = vld [vmem:[#allocation7 + $0x8] sm:$0xff]   ;;  %v853_v9 = vld [vmem:[#allocation7 + $0x10] sm:$0xff]  }
  0x4c   :  { %746 = vmatprep.subr.bf16.mxu0 %v840_v1  ;;  %v851_v6 = vld [vmem:[#allocation7] sm:$0xff]   ;;  %v844_v8 = vld [vmem:[#allocation5 + $0x28] sm:$0xff]   ;;  %v845_v10 = vld [vmem:[#allocation5 + $0x30] sm:$0xff]  }
  0x4d   :  { %768 = vmatprep.subr.bf16.mxu1 %v851_v6  ;;  %v854_v11 = vld [vmem:[#allocation7 + $0x18] sm:$0xff]   ;;  %v855_v13 = vld [vmem:[#allocation7 + $0x20] sm:$0xff]   ;;  %v848_v14 = vld [vmem:[#allocation2 + $0x8] sm:$0xff]  }
  0x4e   :  { %769 = vmatpush3.bf16.msra.mxu1 %v851_v6  ;;  %v846_v12 = vld [vmem:[#allocation5 + $0x38] sm:$0xff]   ;;  %v849_v15 = vld [vmem:[#allocation2 + $0x10] sm:$0xff]   ;;  %v856_v17 = vld [vmem:[#allocation7 + $0x28] sm:$0xff]  }
  0x4f   :  { %747 = vmatpush3.bf16.msra.mxu0 %v840_v1  ;;  %770 = vmatprep.subr.bf16.mxu1 %v852_v7  ;;  %v850_v16 = vld [vmem:[#allocation2 + $0x18] sm:$0xff]   ;;  %v857_v18 = vld [vmem:[#allocation7 + $0x30] sm:$0xff]   ;;  %v859_v20 = vld [vmem:[#allocation8] sm:$0xff]  }
  0x50   :  { %748 = vmatprep.subr.bf16.mxu0 %v841_v2  ;;  %v858_v19 = vld [vmem:[#allocation7 + $0x38] sm:$0xff]   ;;  %v860_v21 = vld [vmem:[#allocation8 + $0x8] sm:$0xff]   ;;  %v861_v22 = vld [vmem:[#allocation8 + $0x10] sm:$0xff]  }
  0x51   :  { %v862_v23 = vld [vmem:[#allocation8 + $0x18] sm:$0xff]   ;;  %v863_v24 = vld [vmem:[#allocation8 + $0x20] sm:$0xff]   ;;  %v864_v62 = vld [vmem:[#allocation8 + $0x28] sm:$0xff]  }
  0x52   :  { %771 = vmatpush3.bf16.msra.mxu1 %v852_v7  ;;  %v638_v25 = vld [vmem:[%s1132_s2] ss:$0 sm:$0xff]  ;;  %v865_v63 = vld [vmem:[#allocation8 + $0x30] sm:$0xff]   ;;  %v866_v0 = vld [vmem:[#allocation8 + $0x38] sm:$0xff]  }
  0x53   :  { %749 = vmatpush3.bf16.msra.mxu0 %v841_v2  ;;  %772 = vmatprep.subr.bf16.mxu1 %v853_v9  ;;  %v651_v1 = vld [vmem:[%s1134_s4] ss:$0 sm:$0xff] }
  0x54   :  { %750 = vmatprep.subr.bf16.mxu0 %v842_v3 }
  0x56   :  { %773 = vmatpush3.bf16.msra.mxu1 %v853_v9 }
  0x57   :  { %751 = vmatpush3.bf16.msra.mxu0 %v842_v3  ;;  %774 = vmatprep.subr.bf16.mxu1 %v854_v11 }
  0x58   :  { %752 = vmatprep.subr.bf16.mxu0 %v843_v5 }
  0x5a   :  { %775 = vmatpush3.bf16.msra.mxu1 %v854_v11 }
  0x5b   :  { %753 = vmatpush3.bf16.msra.mxu0 %v843_v5  ;;  %776 = vmatprep.subr.bf16.mxu1 %v855_v13 }
  0x5c   :  { %754 = vmatprep.subr.bf16.mxu0 %v844_v8 }
  0x5e   :  { %777 = vmatpush3.bf16.msra.mxu1 %v855_v13 }
  0x5f   :  { %755 = vmatpush3.bf16.msra.mxu0 %v844_v8  ;;  %778 = vmatprep.subr.bf16.mxu1 %v856_v17 }
  0x60   :  { %756 = vmatprep.subr.bf16.mxu0 %v845_v10 }
  0x62   :  { %779 = vmatpush3.bf16.msra.mxu1 %v856_v17 }
  0x63   :  { %757 = vmatpush3.bf16.msra.mxu0 %v845_v10  ;;  %780 = vmatprep.subr.bf16.mxu1 %v857_v18 }
  0x64   :  { %758 = vmatprep.subr.bf16.mxu0 %v846_v12 }
  0x66   :  { %781 = vmatpush3.bf16.msra.mxu1 %v857_v18 }
  0x67   :  { %759 = vmatpush3.bf16.msra.mxu0 %v846_v12  ;;  %782 = vmatprep.subr.bf16.mxu1 %v858_v19 }
  0x68   :  { %792 = vmatprep.subr.bf16.mxu0 %v859_v20 }
  0x6a   :  { %761 = vmatmul.mubr.bf16.vlgmr.msra.gmra.mrb[0].mxu0 %v848_v14  ;;  %783 = vmatpush3.bf16.msra.mxu1 %v858_v19 }
  0x6b   :  { %764 = vmatprep.mubr.bf16.mxu0 %v849_v15  ;;  %816 = vmatprep.subr.bf16.mxu1 %v859_v20 }
  0x6c   :  { %793 = vmatpush3.bf16.msra.mxu0 %v859_v20 }
  0x6d   :  { %794 = vmatprep.subr.bf16.mxu0 %v860_v21 }
  0x70   :  { %795 = vmatpush3.bf16.msra.mxu0 %v860_v21 }
  0x71   :  { %796 = vmatprep.subr.bf16.mxu0 %v861_v22 }
  0x72   :  { %765 = vmatmul.mubr.bf16.gmra.mrb[4].mxu0 %v850_v16 }
  0x74   :  { %797 = vmatpush3.bf16.msra.mxu0 %v861_v22 }
  0x75   :  { %798 = vmatprep.subr.bf16.mxu0 %v862_v23 }
  0x78   :  { %799 = vmatpush3.bf16.msra.mxu0 %v862_v23 }
  0x79   :  { %800 = vmatprep.subr.bf16.mxu0 %v863_v24 }
  0x7c   :  { %801 = vmatpush3.bf16.msra.mxu0 %v863_v24 }
  0x7d   :  { %802 = vmatprep.subr.bf16.mxu0 %v864_v62 }
  0x80   :  { %803 = vmatpush3.bf16.msra.mxu0 %v864_v62 }
  0x81   :  { %804 = vmatprep.subr.bf16.mxu0 %v865_v63 }
  0x84   :  { %805 = vmatpush3.bf16.msra.mxu0 %v865_v63 }
  0x85   :  { %806 = vmatprep.subr.bf16.mxu0 %v866_v0 }
  0x88   :  { %807 = vmatpush3.bf16.msra.mxu0 %v866_v0 }
 0x13d   :  { %v762_v26 = vpop.f32.mrb[0].mxu0 }
 0x13e   :  { %v229_v27 = vadd.f32 %v762_v26, %v638_v25  ;;  %v220_v28 = vpop.f32.mrb[1].mxu0 }
 0x13f   :  { %v221_v29 = vadd.f32 %v638_v25, %v220_v28  ;;  %v763_v30 = vpop.f32.mrb[2].mxu0 }
 0x140   :  { %v253_v31 = vmax.f32 %v229_v27, 0.0  ;;  %v232_v32 = vadd.f32 %v763_v30, %v638_v25  ;;  %v223_v33 = vpop.f32.mrb[3].mxu0 }
 0x141   :  { %v251_v34 = vmax.f32 %v221_v29, 0.0  ;;  %v224_v35 = vadd.f32 %v638_v25, %v223_v33 }
 0x142   :  { %v254_v36 = vmax.f32 %v232_v32, 0.0  ;;  %v261_v38 = vmin.f32 %v253_v31, 20.0 }
 0x143   :  { %v252_v37 = vmax.f32 %v224_v35, 0.0  ;;  %v259_v40 = vmin.f32 %v251_v34, 20.0 }
 0x144   :  { %v262_v39 = vmin.f32 %v254_v36, 20.0 }
 0x145   :  { %v260_v41 = vmin.f32 %v252_v37, 20.0  ;;  %v766_v42 = vpop.f32.mrb[4].mxu0 }
 0x146   :  { %v268_v43 = vpack.c.bf16 %v262_v39, %v261_v38  ;;  %v245_v44 = vadd.f32 %v766_v42, %v638_v25  ;;  %v236_v45 = vpop.f32.mrb[5].mxu0  ;;  %v660_v38 = vld [vmem:[%s1136_s6] ss:$0 sm:$0xff]  ;;  %s991_s6 = smov [#allocation10]  }
 0x147   :  { %v237_v46 = vadd.f32 %v638_v25, %v236_v45  ;;  %v767_v47 = vpop.f32.mrb[6].mxu0  ;;  %v267_v48 = vpack.c.bf16 %v260_v41, %v259_v40  ;;  %s624_s30 = sshll.u32 %s991_s6, 4  ;;  %s625_s30 = int_to_ptr.vmem [resolvable:$true] %s624_s30 }
 0x148   :  { %v257_v49 = vmax.f32 %v245_v44, 0.0  ;;  %v248_v50 = vadd.f32 %v767_v47, %v638_v25  ;;  %v239_v51 = vpop.f32.mrb[7].mxu0  ;;  %s955_s8 = scalar_lea.vmem %s625_s30, 512  ;;  %p960_p5 = scmp.lt.s32.totalorder %s625_s30, %s625_s30 }
 0x149   :  { %v255_v52 = vmax.f32 %v237_v46, 0.0  ;;  %v240_v53 = vadd.f32 %v638_v25, %v239_v51  ;;  %784 = vmatprep.mubr.bf16.mxu1 %v267_v48  ;;  %p956_p4 = scmp.ne.s32.totalorder %s625_s30, %s955_s8  ;;  %p961_p6 = scmp.lt.s32.totalorder %s955_s8, %s955_s8 }
 0x14a   :  { %v258_v54 = vmax.f32 %v248_v50, 0.0  ;;  %785 = vmatmul.mubr.bf16.vlgmr.msra.gmra.mrb[0].mxu1 %v268_v43  ;;  %v265_v56 = vmin.f32 %v257_v49, 20.0 }
 0x14b   :  { %v256_v55 = vmax.f32 %v240_v53, 0.0  ;;  %824 = vmatpush3.bf16.msra.mxu1 %v859_v20  ;;  %v263_v58 = vmin.f32 %v255_v52, 20.0  ;;  %p962_p7 = por %p961_p6, %p960_p5 }
 0x14c   :  { %v266_v57 = vmin.f32 %v258_v54, 20.0  ;;  %817 = vmatprep.subr.bf16.mxu1 %v860_v21 }
 0x14d   :  { %v264_v59 = vmin.f32 %v256_v55, 20.0  ;;  %p963_p8 = pnand %p962_p7, %p956_p4 }
 0x14e   :  { %v270_v60 = vpack.c.bf16 %v266_v57, %v265_v56 }
 0x14f   :  { %v269_v61 = vpack.c.bf16 %v264_v59, %v263_v58  ;;  %825 = vmatpush3.bf16.msra.mxu1 %v860_v21 }
 0x150   :  { %818 = vmatprep.subr.bf16.mxu1 %v861_v22 }
 0x151   :  { %788 = vmatprep.mubr.bf16.mxu1 %v269_v61 }
 0x152   :  { %789 = vmatmul.mubr.bf16.gmra.mrb[4].mxu1 %v270_v60 }
 0x153   :  { %826 = vmatpush3.bf16.msra.mxu1 %v861_v22 }
 0x154   :  { %819 = vmatprep.subr.bf16.mxu1 %v862_v23 }
 0x157   :  { %827 = vmatpush3.bf16.msra.mxu1 %v862_v23 }
 0x158   :  { %820 = vmatprep.subr.bf16.mxu1 %v863_v24 }
 0x15b   :  { %828 = vmatpush3.bf16.msra.mxu1 %v863_v24 }
 0x15c   :  { %821 = vmatprep.subr.bf16.mxu1 %v864_v62 }
 0x15f   :  { %829 = vmatpush3.bf16.msra.mxu1 %v864_v62 }
 0x160   :  { %822 = vmatprep.subr.bf16.mxu1 %v865_v63 }
 0x163   :  { %830 = vmatpush3.bf16.msra.mxu1 %v865_v63 }
 0x164   :  { %823 = vmatprep.subr.bf16.mxu1 %v866_v0 }
 0x167   :  { %831 = vmatpush3.bf16.msra.mxu1 %v866_v0 }
 0x21d   :  { %v786_v2 = vpop.f32.mrb[0].mxu1 }
 0x21e   :  { %v385_v3 = vadd.f32 %v786_v2, %v651_v1  ;;  %v376_v4 = vpop.f32.mrb[1].mxu1 }
 0x21f   :  { %v377_v5 = vadd.f32 %v651_v1, %v376_v4  ;;  %v787_v6 = vpop.f32.mrb[2].mxu1 }
 0x220   :  { %v409_v7 = vmax.f32 %v385_v3, 0.0  ;;  %v388_v8 = vadd.f32 %v787_v6, %v651_v1  ;;  %v379_v9 = vpop.f32.mrb[3].mxu1 }
 0x221   :  { %v407_v10 = vmax.f32 %v377_v5, 0.0  ;;  %v380_v11 = vadd.f32 %v651_v1, %v379_v9 }
 0x222   :  { %v410_v12 = vmax.f32 %v388_v8, 0.0  ;;  %v417_v14 = vmin.f32 %v409_v7, 20.0 }
 0x223   :  { %v408_v13 = vmax.f32 %v380_v11, 0.0  ;;  %v415_v16 = vmin.f32 %v407_v10, 20.0 }
 0x224   :  { %v418_v15 = vmin.f32 %v410_v12, 20.0 }
 0x225   :  { %v416_v17 = vmin.f32 %v408_v13, 20.0  ;;  %v790_v18 = vpop.f32.mrb[4].mxu1 }
 0x226   :  { %v424_v19 = vpack.c.bf16 %v418_v15, %v417_v14  ;;  %v401_v20 = vadd.f32 %v790_v18, %v651_v1  ;;  %v392_v21 = vpop.f32.mrb[5].mxu1 }
 0x227   :  { %v423_v22 = vpack.c.bf16 %v416_v17, %v415_v16  ;;  %v393_v23 = vadd.f32 %v651_v1, %v392_v21  ;;  %v791_v24 = vpop.f32.mrb[6].mxu1 }
 0x228   :  { %v413_v25 = vmax.f32 %v401_v20, 0.0  ;;  %v404_v26 = vadd.f32 %v791_v24, %v651_v1  ;;  %v395_v27 = vpop.f32.mrb[7].mxu1 }
 0x229   :  { %v411_v28 = vmax.f32 %v393_v23, 0.0  ;;  %v396_v29 = vadd.f32 %v651_v1, %v395_v27  ;;  %808 = vmatprep.mubr.bf16.mxu0 %v423_v22 }
 0x22a   :  { %v414_v30 = vmax.f32 %v404_v26, 0.0  ;;  %809 = vmatmul.mubr.bf16.vlgmr.msra.gmra.mrb[8].mxu0 %v424_v19  ;;  %v421_v32 = vmin.f32 %v413_v25, 20.0 }
 0x22b   :  { %v412_v31 = vmax.f32 %v396_v29, 0.0  ;;  %v419_v34 = vmin.f32 %v411_v28, 20.0 }
 0x22c   :  { %v422_v33 = vmin.f32 %v414_v30, 20.0 }
 0x22d   :  { %v420_v35 = vmin.f32 %v412_v31, 20.0 }
 0x22e   :  { %v426_v36 = vpack.c.bf16 %v422_v33, %v421_v32 }
 0x22f   :  { %v425_v37 = vpack.c.bf16 %v420_v35, %v419_v34 }
 0x231   :  { %812 = vmatprep.mubr.bf16.mxu1 %v425_v37 }
 0x232   :  { %813 = vmatmul.mubr.bf16.vlgmr.msra.gmra.mrb[8].mxu1 %v426_v36 }
 0x2fd   :  { %v810_v39 = vpop.f32.mrb[8].mxu0 }
 0x2fe   :  { %v541_v40 = vadd.f32 %v810_v39, %v660_v38  ;;  %v532_v41 = vpop.f32.mrb[9].mxu0 }
 0x2ff   :  { %v533_v42 = vadd.f32 %v660_v38, %v532_v41  ;;  %v811_v43 = vpop.f32.mrb[10].mxu0 }
 0x300   :  { %v565_v44 = vmax.f32 %v541_v40, 0.0  ;;  %v544_v45 = vadd.f32 %v811_v43, %v660_v38  ;;  %v535_v46 = vpop.f32.mrb[11].mxu0 }
 0x301   :  { %v563_v47 = vmax.f32 %v533_v42, 0.0  ;;  %v536_v48 = vadd.f32 %v660_v38, %v535_v46 }
 0x302   :  { %v566_v49 = vmax.f32 %v544_v45, 0.0  ;;  %v573_v51 = vmin.f32 %v565_v44, 20.0 }
 0x303   :  { %v564_v50 = vmax.f32 %v536_v48, 0.0  ;;  %v571_v53 = vmin.f32 %v563_v47, 20.0 }
 0x304   :  { %v574_v52 = vmin.f32 %v566_v49, 20.0 }
 0x305   :  { %v572_v54 = vmin.f32 %v564_v50, 20.0  ;;  %v814_v55 = vpop.f32.mrb[8].mxu1 }
 0x306   :  { %v693_v56 = vpack.c.bf16 %v574_v52, %v573_v51  ;;  %v557_v57 = vadd.f32 %v814_v55, %v660_v38  ;;  %v548_v58 = vpop.f32.mrb[9].mxu1 }
 0x307   :  { %v688_v59 = vpack.c.bf16 %v572_v54, %v571_v53  ;;  %v549_v60 = vadd.f32 %v660_v38, %v548_v58  ;;  %v815_v61 = vpop.f32.mrb[10].mxu1 }
 0x308   :  { %705 = vst [vmem:[#allocation10 + $0x8] sm:$0xff] %v693_v56   ;;  %v569_v62 = vmax.f32 %v557_v57, 0.0  ;;  %v560_v63 = vadd.f32 %v815_v61, %v660_v38  ;;  %v551_v0 = vpop.f32.mrb[11].mxu1 }
 0x309   :  { %689 = vst [vmem:[#allocation10] sm:$0xff] %v688_v59   ;;  %v567_v1 = vmax.f32 %v549_v60, 0.0  ;;  %v552_v2 = vadd.f32 %v660_v38, %v551_v0 }
 0x30a   :  { %v570_v3 = vmax.f32 %v560_v63, 0.0  ;;  %v577_v5 = vmin.f32 %v569_v62, 20.0 }
 0x30b   :  { %v568_v4 = vmax.f32 %v552_v2, 0.0  ;;  %v575_v7 = vmin.f32 %v567_v1, 20.0 }
 0x30c   :  { %v578_v6 = vmin.f32 %v570_v3, 20.0 }
 0x30d   :  { %v576_v8 = vmin.f32 %v568_v4, 20.0 }
 0x30e   :  { %v703_v9 = vpack.c.bf16 %v578_v6, %v577_v5 }
 0x30f   :  { %v698_v10 = vpack.c.bf16 %v576_v8, %v575_v7 }
 0x310   :  { %707 = vst [vmem:[#allocation10 + $0x18] sm:$0xff] %v703_v9  }
 0x311   :  { %706 = vst [vmem:[#allocation10 + $0x10] sm:$0xff] %v698_v10  }
 0x312   :  { %966 = shalt.err (!%p963_p8)
}
 0x313   :  { %s967_s11 = scalar_lea.hbm %s1137_s7, 512 }
 0x314   :  { %p968_p9 = scmp.ne.s32.totalorder %s1137_s7, %s967_s11  ;;  %p971_p10 = scmp.lt.u32.totalorder %s967_s11, %s1137_s7 }
 0x316   :  { %p973_p11 = pnand %p971_p10, %p968_p9 }
 0x318   :  { %976 = shalt.err (!%p973_p11)
}
 0x319   :  { %630 = dma.vmem_to_hbm [thread:$0]  %s625_s30, 512, %s1137_s7, [#allocation4], %s987_s13, %s987_s13, %s988_s14  }
 0x31a   :  { %983 = dma.done.wait [#allocation4], 512  }
 0x31b   :  { %984 = vsyncadd [#allocation4], 4294966784 }
 0x31c   :  { %634 = vsyncpa [#allocation3], 1 }
 0x31d   :  { %635 = vsyncpa [#allocation6], 1 }
 0x31e   :  { %636 = vsyncpa [#allocation9], 1 }
 0x31f   :  { %637 = vsyncpa [#allocation4], 1 }

</bundles_post_ra>
